<compile_context>
chip_gen: v6e
topology: v6e:2x2x1
jax: 0.10.0
libtpu: 0.0.40
codegen_flags: <defaults>
</compile_context>

<pallas_src>
import jax
import jax.numpy as jnp
from jax.experimental import pallas as pl
from jax.experimental.pallas import tpu as pltpu


def _round_up(x, m):
    return ((x + m - 1) // m) * m


def _cdiv(a, b):
    return (a + b - 1) // b


def _vmem_capacity_bytes():
    try:
        info = pltpu.get_tpu_info()
        cap = int(getattr(info, "vmem_capacity_bytes", 0) or 0)
        if cap > 0:
            return cap
    except Exception:
        pass
    return 64 * 1024 * 1024  # v7x physical VMEM: safe lower bound for all generations


def _plan(batch, n_features):
    """Choose (tile_b, tile_f, num_b, num_k, padded_batch, vmem_limit_bytes)."""
    f_pad = _round_up(n_features, 128)          # lane padding -> true VMEM bytes per row
    row_bytes = f_pad * 4
    cap = _vmem_capacity_bytes()
    vmem_limit = min(cap * 3 // 4, 96 * 1024 * 1024)   # ~48 MiB on v7x, 96 MiB on v5e/v6e
    # One x tile at ~1/6 of the limit: 2x double-buffered x + ~1 tile of x*w temporary
    # + weight/output/accumulator + headroom.
    x_tile_bytes = min(8 * 1024 * 1024, vmem_limit // 6)

    if 128 * row_bytes <= x_tile_bytes:
        # Full feature dim fits a >=128-row tile: single reduction step.
        tile_f = n_features
        num_k = 1
        tile_b = max(128, (x_tile_bytes // row_bytes) // 128 * 128)
    else:
        # Very wide features: split the reduction over a second ("arbitrary") grid axis.
        tile_b = 128
        tile_f = max(128, (x_tile_bytes // (128 * 4)) // 128 * 128)
        num_k = _cdiv(n_features, tile_f)

    num_b = _cdiv(batch, tile_b)
    if num_b == 1 and batch > 128:
        # Keep >=2 batch tiles so both v7x TensorCores get work (neutral on 1-TC chips).
        tile_b = _round_up(_cdiv(batch, 2), 128)
        num_b = _cdiv(batch, tile_b)
    elif num_b == 1:
        tile_b = 128                              # lane-dense single-tile output row

    padded_batch = num_b * tile_b
    return tile_b, tile_f, num_b, num_k, padded_batch, vmem_limit


def _make_kernel(tile_f, n_features, mask_tail):
    def kernel(x_ref, w_ref, b_ref, o_ref, acc_ref):
        # x_ref: (tile_b, tile_f) VMEM   w_ref: (1, tile_f) VMEM
        # b_ref: (1,) SMEM               o_ref: (1, tile_b) VMEM
        # acc_ref: (1, tile_b) f32 VMEM scratch (resident across the k axis)
        k = pl.program_id(1)

        @pl.when(k == 0)
        def _init():
            acc_ref[...] = jnp.zeros_like(acc_ref)

        prods = x_ref[...] * w_ref[...]                      # VPU broadcast multiply
        if mask_tail:
            # Ragged last feature block: zero out columns >= n_features (also kills any
            # NaN/Inf garbage read past the array bounds).
            col = jax.lax.broadcasted_iota(jnp.int32, prods.shape, 1)
            prods = jnp.where(col + k * tile_f < n_features, prods, 0.0)
        acc_ref[0, :] += jnp.sum(prods, axis=-1)             # XLU lane reduce -> lane-dense row

        @pl.when(k == pl.num_programs(1) - 1)
        def _finalize():
            o_ref[0, :] = (acc_ref[0, :] + b_ref[0]).astype(o_ref.dtype)

    return kernel


def linear_model(x, weight, bias):
    """Forward of nn.Linear(n_features, 1).

    Args:
      x:      (batch, n_features) float32
      weight: (1, n_features) float32  (PyTorch layout, used as-is)
      bias:   (1,) float32
    Returns:
      (batch, 1) float32
    """
    batch, n_features = x.shape
    tile_b, tile_f, num_b, num_k, padded_batch, vmem_limit = _plan(batch, n_features)
    mask_tail = (num_k > 1) and (n_features % tile_f != 0)

    out_row = pl.pallas_call(
        _make_kernel(tile_f, n_features, mask_tail),
        out_shape=jax.ShapeDtypeStruct((1, padded_batch), x.dtype),
        grid=(num_b, num_k),
        in_specs=[
            pl.BlockSpec((tile_b, tile_f), lambda i, k: (i, k)),       # x tile (pipelined; ragged boundary OK)
            pl.BlockSpec((1, tile_f), lambda i, k: (0, k)),            # weight chunk (resident across i)
            pl.BlockSpec(memory_space=pltpu.MemorySpace.SMEM),         # bias scalar
        ],
        out_specs=pl.BlockSpec((1, tile_b), lambda i, k: (0, i)),      # lane-dense output row
        scratch_shapes=[pltpu.VMEM((1, tile_b), jnp.float32)],         # f32 accumulator
        compiler_params=pltpu.CompilerParams(
            dimension_semantics=("parallel", "arbitrary"),
            vmem_limit_bytes=vmem_limit,
        ),
        cost_estimate=pl.CostEstimate(
            flops=2 * batch * n_features,
            transcendentals=0,
            bytes_accessed=4 * (batch * n_features + n_features + batch + 1),
        ),
    )(x, weight, bias)

    return out_row[0, :batch][:, None]


if __name__ == "__main__":
    key = jax.random.PRNGKey(0)
    kx, kw, kb, kx2, kx3 = jax.random.split(key, 5)

    n_features = 32
    bound = 1.0 / (n_features ** 0.5)
    weight = jax.random.uniform(kw, (1, n_features), jnp.float32, -bound, bound)
    bias = jax.random.uniform(kb, (1,), jnp.float32, -bound, bound)

    # Small demo batch (single 128-row tile, no wrapper padding of x).
    batch = 8
    x = jax.random.normal(kx, (batch, n_features), jnp.float32)
    out = jax.block_until_ready(linear_model(x, weight, bias))
    ref = x @ weight.T + bias
    assert out.shape == (batch, 1)
    assert jnp.allclose(out, ref, atol=1e-5, rtol=1e-5), "mismatch vs reference (small batch)"

    # Multi-tile ragged-batch path: 2 parallel batch tiles, ragged last block.
    batch2 = 2500
    x2 = jax.random.normal(kx2, (batch2, n_features), jnp.float32)
    out2 = jax.block_until_ready(linear_model(x2, weight, bias))
    ref2 = x2 @ weight.T + bias
    assert out2.shape == (batch2, 1)
    assert jnp.allclose(out2, ref2, atol=1e-4, rtol=1e-5), "mismatch vs reference (tiled batch)"

    # Non-multiple-of-128 feature count (block covers full F, lane-padded VMEM accounting).
    nf3, batch3 = 200, 300
    bound3 = 1.0 / (nf3 ** 0.5)
    w3 = jax.random.uniform(kw, (1, nf3), jnp.float32, -bound3, bound3)
    b3 = jax.random.uniform(kb, (1,), jnp.float32, -bound3, bound3)
    x3 = jax.random.normal(kx3, (batch3, nf3), jnp.float32)
    out3 = jax.block_until_ready(linear_model(x3, w3, b3))
    ref3 = x3 @ w3.T + b3
    assert out3.shape == (batch3, 1)
    assert jnp.allclose(out3, ref3, atol=1e-4, rtol=1e-5), "mismatch vs reference (F=200)"

    print("KERNEL_OK")
</pallas_src>

<mosaic_0001>
module attributes {stable_mosaic.version = 11 : i64} {
  func.func @kernel(%arg0: i32, %arg1: i32, %arg2: memref<128x32xf32, #tpu.memory_space<vmem>>, %arg3: memref<1x32xf32, #tpu.memory_space<vmem>>, %arg4: memref<1xf32, #tpu.memory_space<smem>>, %arg5: memref<1x128xf32, #tpu.memory_space<vmem>>, %arg6: memref<1x128xf32, #tpu.memory_space<vmem>>) attributes {dimension_semantics = [#tpu.dimension_semantics<parallel>, #tpu.dimension_semantics<arbitrary>], iteration_bounds = array<i64: 1, 1>, scalar_prefetch = 0 : i64, scratch_operands = 1 : i64, tpu.core_type = #tpu.core_type<tc>, window_params = [{transform_indices = @transform_0, window_bounds = array<i64: 128, 32>}, {transform_indices = @transform_1, window_bounds = array<i64: 1, 32>}, {transform_indices = @transform_2, window_bounds = array<i64: 1>}, {transform_indices = @transform_3, window_bounds = array<i64: 1, 128>}]} {
    %c0_i32 = arith.constant 0 : i32
    %0 = arith.cmpi eq, %arg1, %c0_i32 : i32
    %1 = arith.extui %0 : i1 to i32
    %c0_i32_0 = arith.constant 0 : i32
    %2 = arith.cmpi ne, %1, %c0_i32_0 : i32
    scf.if %2 {
      %cst_10 = arith.constant 0.000000e+00 : f32
      %17 = vector.broadcast %cst_10 : f32 to vector<1x128xf32>
      %c0_11 = arith.constant 0 : index
      %c0_12 = arith.constant 0 : index
      %18 = vector.load %arg6[%c0_11, %c0_12] : memref<1x128xf32, #tpu.memory_space<vmem>>, vector<1x128xf32>
      tpu.vector_store %arg6[%c0_11, %c0_12], %17 {strides = array<i32>} : memref<1x128xf32, #tpu.memory_space<vmem>>, vector<1x128xf32>,
    } else {
    }
    %c0 = arith.constant 0 : index
    %c0_1 = arith.constant 0 : index
    %3 = vector.load %arg2[%c0, %c0_1] : memref<128x32xf32, #tpu.memory_space<vmem>>, vector<128x32xf32>
    %c0_2 = arith.constant 0 : index
    %c0_3 = arith.constant 0 : index
    %4 = vector.load %arg3[%c0_2, %c0_3] : memref<1x32xf32, #tpu.memory_space<vmem>>, vector<1x32xf32>
    %5 = vector.broadcast %4 : vector<1x32xf32> to vector<128x32xf32>
    %6 = arith.mulf %3, %5 : vector<128x32xf32>
    %c0_4 = arith.constant 0 : index
    %c0_5 = arith.constant 0 : index
    %7 = vector.load %arg6[%c0_4, %c0_5] : memref<1x128xf32, #tpu.memory_space<vmem>>, vector<1x128xf32>
    %8 = vector.shape_cast %7 : vector<1x128xf32> to vector<128xf32>
    %cst = arith.constant dense<0.000000e+00> : vector<128xf32>
    %9 = vector.multi_reduction <add>, %6, %cst [1] : vector<128x32xf32> to vector<128xf32>
    %10 = arith.addf %8, %9 : vector<128xf32>
    %c0_6 = arith.constant 0 : index
    %c0_7 = arith.constant 0 : index
    %11 = vector.load %arg6[%c0_6, %c0_7] : memref<1x128xf32, #tpu.memory_space<vmem>>, vector<1x128xf32>
    %12 = vector.shape_cast %11 : vector<1x128xf32> to vector<128xf32>
    %13 = vector.shape_cast %10 : vector<128xf32> to vector<1x128xf32>
    tpu.vector_store %arg6[%c0_6, %c0_7], %13 {strides = array<i32>} : memref<1x128xf32, #tpu.memory_space<vmem>>, vector<1x128xf32>,
    %c0_i32_8 = arith.constant 0 : i32
    %14 = arith.cmpi eq, %arg1, %c0_i32_8 : i32
    %15 = arith.extui %14 : i1 to i32
    %c0_i32_9 = arith.constant 0 : i32
    %16 = arith.cmpi ne, %15, %c0_i32_9 : i32
    scf.if %16 {
      %c0_10 = arith.constant 0 : index
      %c0_11 = arith.constant 0 : index
      %17 = vector.load %arg6[%c0_10, %c0_11] : memref<1x128xf32, #tpu.memory_space<vmem>>, vector<1x128xf32>
      %18 = vector.shape_cast %17 : vector<1x128xf32> to vector<128xf32>
      %c0_12 = arith.constant 0 : index
      %19 = memref.load %arg4[%c0_12] : memref<1xf32, #tpu.memory_space<smem>>
      %20 = vector.broadcast %19 : f32 to vector<128xf32>
      %21 = arith.addf %18, %20 : vector<128xf32>
      %c0_13 = arith.constant 0 : index
      %c0_14 = arith.constant 0 : index
      %22 = vector.load %arg5[%c0_13, %c0_14] : memref<1x128xf32, #tpu.memory_space<vmem>>, vector<1x128xf32>
      %23 = vector.shape_cast %22 : vector<1x128xf32> to vector<128xf32>
      %24 = vector.shape_cast %21 : vector<128xf32> to vector<1x128xf32>
      tpu.vector_store %arg5[%c0_13, %c0_14], %24 {strides = array<i32>} : memref<1x128xf32, #tpu.memory_space<vmem>>, vector<1x128xf32>,
    } else {
    }
    return
  }
  func.func @transform_0(%arg0: i32, %arg1: i32) -> (i32, i32) {
    %c0_i32 = arith.constant 0 : i32
    return %arg0, %arg1 : i32, i32
  }
  func.func @transform_1(%arg0: i32, %arg1: i32) -> (i32, i32) {
    %c0_i32 = arith.constant 0 : i32
    %c0_i32_0 = arith.constant 0 : i32
    return %c0_i32, %arg1 : i32, i32
  }
  func.func @transform_2(%arg0: i32, %arg1: i32) -> i32 {
    %c0_i32 = arith.constant 0 : i32
    %c0_i32_0 = arith.constant 0 : i32
    return %c0_i32 : i32
  }
  func.func @transform_3(%arg0: i32, %arg1: i32) -> (i32, i32) {
    %c0_i32 = arith.constant 0 : i32
    %c0_i32_0 = arith.constant 0 : i32
    return %c0_i32, %arg0 : i32, i32
  }
}

</mosaic_0001>

<bundles_post_ra>
// kernel: tpu_custom_call.1
= control target key start
LH: loop header
LB: loop body
LE: loop exit
PB: predicated region body
PF: predicated region fallthrough
CT: control target
= control target key end

     0   :  { %9 = vsyncpa [#allocation5], 0  ;;  %s2065_s0 = inlined_call_operand.hbm [shape: f32[8,32], index: 0, kind: input, shape index: {}]   ;;  %s2066_s1 = inlined_call_operand.vmem [shape: f32[1,32], index: 1, kind: input, shape index: {}]   ;;  %s2067_s2 = inlined_call_operand.<no memory space> [shape: f32[1], index: 2, kind: input, shape index: {}]   ;;  %s2068_s3 = inlined_call_operand.hbm [shape: f32[1,128], index: 3, kind: output, shape index: {}]  }
   0x1   :  { %10 = vsyncpa [#allocation6], 0 }
   0x2   :  { %15 = vsyncadd [#allocation5], 1920  ;;  %s1689_s12 = smov [#allocation4]  }
   0x3   :  { %s16_s13 = sshll.u32 %s1689_s12, 4  ;;  %s17_s13 = int_to_ptr.vmem [resolvable:$true] %s16_s13 }
   0x4   :  { %s1653_s14 = scalar_lea.vmem %s17_s13, 128  ;;  %s1657_s15 = scalar_lea.vmem %s17_s13, 2048 }
   0x5   :  { %p1654_p0 = scmp.ne.s32.totalorder %s17_s13, %s1653_s14  ;;  %p1658_p1 = scmp.lt.s32.totalorder %s17_s13, %s17_s13 }
   0x6   :  { %p1659_p2 = scmp.lt.s32.totalorder %s1657_s15, %s1653_s14 }
   0x8   :  { %p1660_p3 = por %p1659_p2, %p1658_p1 }
   0xa   :  { %p1661_p4 = pnand %p1660_p3, %p1654_p0 }
   0xc   :  { %1664 = shalt.err (!%p1661_p4)
}
   0xd   :  { %s1690_s16 = smov 128   ;;  %s1691_s17 = smov 8  }
   0xe   :  { %22 = dma.hbm_to_vmem [thread:$0]  %s2065_s0, 128, %s17_s13, [#allocation5], %s1690_s16, %s1690_s16, %s1691_s17  }
   0xf   :  { %1685 = dma.done.wait [#allocation5], 2048  }
  0x10   :  { %1686 = vsyncadd [#allocation5], 4294965248  ;;  %v35_v0 = vld [vmem:[#allocation4] sm:$0xff]  ;;  %v1635_v1 = vld [vmem:[%s2066_s1] ss:$0 sm:$0xff]  ;;  %vm75_vm0 = vcmask 261120   ;;  %v140_v50 = vlaneseq }
  0x11   :  { %v37_v2 = vld [vmem:[#allocation4 + $0x10] sm:$0xff]  ;;  %v58_v3 = vmul.f32 %v1635_v1, %v35_v0  ;;  %v36_v5 = vld [vmem:[#allocation4 + $0x8] sm:$0xff]  ;;  %v38_v6 = vld [vmem:[#allocation4 + $0x18] sm:$0xff]  ;;  %v1692_v43 = vmov 0   ;;  %v1693_v51 = vmov 1966171168  }
  0x12   :  { %v60_v4 = vmul.f32 %v1635_v1, %v37_v2  ;;  %v59_v7 = vmul.f32 %v1635_v1, %v36_v5  ;;  %v61_v8 = vmul.f32 %v1635_v1, %v38_v6  ;;  %v40_v9 = vld [vmem:[#allocation4 + $0x28] sm:$0xff]  ;;  %v39_v10 = vld [vmem:[#allocation4 + $0x20] sm:$0xff]  ;;  %v42_v17 = vld [vmem:[#allocation4 + $0x38] sm:$0xff]  ;;  %1643 = vset.pattern.permute.xlu0 %v1692_v43  ;;  %1644 = vset.pattern.permute.xlu1 %v1692_v43  ;;  %v657_v52 = vunpack.c.l.s4 %v1693_v51  ;;  %s1695_s22 = smov [#allocation7]  }
  0x13   :  { %v76_v11 = vsel %vm75_vm0, %v58_v3, 0.0  ;;  %v63_v15 = vmul.f32 %v1635_v1, %v40_v9  ;;  %v62_v16 = vmul.f32 %v1635_v1, %v39_v10  ;;  %v41_v18 = vld [vmem:[#allocation4 + $0x30] sm:$0xff]  ;;  %v65_v20 = vmul.f32 %v1635_v1, %v42_v17  ;;  %v44_v23 = vld [vmem:[#allocation4 + $0x48] sm:$0xff]  ;;  %v43_v24 = vld [vmem:[#allocation4 + $0x40] sm:$0xff]  ;;  %s1626_s23 = sshll.u32 %s1695_s22, 4  ;;  %s1627_s23 = int_to_ptr.vmem [resolvable:$true] %s1626_s23 }
  0x14   :  { %v82_v12 = vsel %vm75_vm0, %v60_v4, 0.0  ;;  %77 = vadd.xlane.f32.xlu0 %v76_v11  ;;  %v79_v13 = vsel %vm75_vm0, %v59_v7, 0.0  ;;  %v85_v14 = vsel %vm75_vm0, %v61_v8, 0.0  ;;  %v64_v22 = vmul.f32 %v1635_v1, %v41_v18  ;;  %v46_v29 = vld [vmem:[#allocation4 + $0x58] sm:$0xff]  ;;  %v45_v30 = vld [vmem:[#allocation4 + $0x50] sm:$0xff]  ;;  %v48_v33 = vld [vmem:[#allocation4 + $0x68] sm:$0xff]  ;;  %p1670_p6 = scmp.lt.s32.totalorder %s1627_s23, %s1627_s23 }
  0x15   :  { %83 = vadd.xlane.f32.xlu1 %v82_v12  ;;  %v91_v19 = vsel %vm75_vm0, %v63_v15, 0.0  ;;  %v88_v21 = vsel %vm75_vm0, %v62_v16, 0.0  ;;  %v97_v25 = vsel %vm75_vm0, %v65_v20, 0.0  ;;  %v67_v26 = vmul.f32 %v1635_v1, %v44_v23  ;;  %v47_v36 = vld [vmem:[#allocation4 + $0x60] sm:$0xff]  ;;  %v50_v41 = vld [vmem:[#allocation4 + $0x78] sm:$0xff]  ;;  %v49_v42 = vld [vmem:[#allocation4 + $0x70] sm:$0xff] }
  0x16   :  { %v94_v27 = vsel %vm75_vm0, %v64_v22, 0.0  ;;  %v66_v28 = vmul.f32 %v1635_v1, %v43_v24  ;;  %v69_v32 = vmul.f32 %v1635_v1, %v46_v29  ;;  %v68_v35 = vmul.f32 %v1635_v1, %v45_v30  ;;  %s1665_s24 = scalar_lea.vmem %s1627_s23, 16  ;;  %s1669_s25 = scalar_lea.vmem %s1627_s23, 32 }
  0x17   :  { %v103_v31 = vsel %vm75_vm0, %v67_v26, 0.0  ;;  %v71_v37 = vmul.f32 %v1635_v1, %v48_v33  ;;  %v70_v40 = vmul.f32 %v1635_v1, %v47_v36  ;;  %v73_v45 = vmul.f32 %v1635_v1, %v50_v41  ;;  %p1666_p5 = scmp.ne.s32.totalorder %s1627_s23, %s1665_s24  ;;  %p1671_p7 = scmp.lt.s32.totalorder %s1669_s25, %s1665_s24 }
  0x18   :  { %80 = vadd.xlane.f32.xlu0 %v79_v13  ;;  %v100_v34 = vsel %vm75_vm0, %v66_v28, 0.0  ;;  %v109_v38 = vsel %vm75_vm0, %v69_v32, 0.0  ;;  %v106_v39 = vsel %vm75_vm0, %v68_v35, 0.0  ;;  %v72_v47 = vmul.f32 %v1635_v1, %v49_v42 }
  0x19   :  { %86 = vadd.xlane.f32.xlu1 %v85_v14  ;;  %v115_v44 = vsel %vm75_vm0, %v71_v37, 0.0  ;;  %v112_v46 = vsel %vm75_vm0, %v70_v40, 0.0  ;;  %v121_v48 = vsel %vm75_vm0, %v73_v45, 0.0  ;;  %v1739_v53 = vshrl.u32 %v140_v50, 7  ;;  %p1672_p8 = por %p1671_p7, %p1670_p6 }
  0x1a   :  { %v118_v49 = vsel %vm75_vm0, %v72_v47, 0.0  ;;  %v658_v54 = vunpack.c.0.s8 %v657_v52  ;;  %vm1495_vm1 = vcmask 130112   ;;  %vm1502_vm2 = vcmask 195712  }
  0x1b   :  { %v1742_v55 = vsub.s32 0, %v1739_v53  ;;  %v1745_v56 = vsub.s32 1, %v1739_v53  ;;  %v1748_v57 = vsub.s32 2, %v1739_v53  ;;  %v1751_v58 = vsub.s32 3, %v1739_v53  ;;  %p1673_p9 = pnand %p1672_p8, %p1666_p5 }
  0x1c   :  { %89 = vadd.xlane.f32.xlu0 %v88_v21  ;;  %v1754_v59 = vsub.s32 4, %v1739_v53  ;;  %v1757_v60 = vsub.s32 5, %v1739_v53  ;;  %v1760_v61 = vsub.s32 6, %v1739_v53  ;;  %v1763_v62 = vsub.s32 7, %v1739_v53 }
  0x1d   :  { %92 = vadd.xlane.f32.xlu1 %v91_v19  ;;  %v1766_v1 = vsub.s32 %v658_v54, %v1739_v53  ;;  %vm1509_vm3 = vcmask 261312   ;;  %vm1516_vm4 = vcmask 326912   ;;  %vm1523_vm5 = vcmask 392512  }
  0x1e   :  { %vm1530_vm6 = vcmask 458112   ;;  %vm1537_vm7 = vcmask 523712   ;;  %vm1544_vm8 = vcmask 589312   ;;  %vm1551_vm9 = vcmask 654912  }
  0x1f   :  { %vm1558_vm10 = vcmask 720512   ;;  %vm1565_vm11 = vcmask 786112   ;;  %vm1572_vm12 = vcmask 851712   ;;  %vm1579_vm13 = vcmask 917312  }
  0x20   :  { %95 = vadd.xlane.f32.xlu0 %v94_v27  ;;  %vm1586_vm14 = vcmask 982912   ;;  %vm1593_vm15 = vcmask 1048512  }
  0x21   :  { %98 = vadd.xlane.f32.xlu1 %v97_v25 }
  0x24   :  { %101 = vadd.xlane.f32.xlu0 %v100_v34 }
  0x25   :  { %104 = vadd.xlane.f32.xlu1 %v103_v31 }
  0x28   :  { %107 = vadd.xlane.f32.xlu0 %v106_v39 }
  0x29   :  { %110 = vadd.xlane.f32.xlu1 %v109_v38 }
  0x2c   :  { %113 = vadd.xlane.f32.xlu0 %v112_v46 }
  0x2d   :  { %116 = vadd.xlane.f32.xlu1 %v115_v44 }
  0x30   :  { %119 = vadd.xlane.f32.xlu0 %v118_v49 }
  0x31   :  { %122 = vadd.xlane.f32.xlu1 %v121_v48 }
  0x9d   :  { %v78_v63 = vpop.xlane.xlu0 %77 }
  0x9e   :  { %v84_v0 = vpop.xlane.xlu1 %83  ;;  %v143_v2 = vrot.slane %v78_v63, %v1742_v55  ;;  %v147_v3 = vrot.slane %v78_v63, %v1745_v56  ;;  %v151_v4 = vrot.slane %v78_v63, %v1748_v57  ;;  %v155_v5 = vrot.slane %v78_v63, %v1751_v58 }
  0x9f   :  { %v159_v6 = vrot.slane %v78_v63, %v1754_v59  ;;  %v163_v7 = vrot.slane %v78_v63, %v1757_v60  ;;  %v167_v8 = vrot.slane %v78_v63, %v1760_v61  ;;  %v171_v9 = vrot.slane %v78_v63, %v1763_v62 }
  0xa0   :  { %v652_v10 = vcombine.low %v143_v2, %v147_v3  ;;  %v653_v11 = vcombine.low %v151_v4, %v155_v5  ;;  %v207_v12 = vrot.slane %v84_v0, %v1742_v55  ;;  %v211_v13 = vrot.slane %v84_v0, %v1745_v56 }
  0xa1   :  { %v81_v14 = vpop.xlane.xlu0 %80  ;;  %v654_v16 = vcombine.low %v159_v6, %v163_v7  ;;  %v655_v17 = vcombine.low %v167_v8, %v171_v9  ;;  %v215_v18 = vrot.slane %v84_v0, %v1748_v57  ;;  %v219_v19 = vrot.slane %v84_v0, %v1751_v58 }
  0xa2   :  { %v1778_v15 = vpop.xlane.xlu1 %86  ;;  %v662_v20 = vrot.slane %v652_v10, %v1766_v1  ;;  %v669_v21 = vrot.slane %v653_v11, %v1766_v1  ;;  %v175_v22 = vrot.slane %v81_v14, %v1742_v55  ;;  %v179_v23 = vrot.slane %v81_v14, %v1745_v56 }
  0xa3   :  { %v676_v24 = vrot.slane %v654_v16, %v1766_v1  ;;  %v683_v25 = vrot.slane %v655_v17, %v1766_v1  ;;  %v183_v26 = vrot.slane %v81_v14, %v1748_v57  ;;  %v187_v27 = vrot.slane %v81_v14, %v1751_v58 }
  0xa4   :  { %v684_v28 = vcombine.low %v662_v20, %v669_v21  ;;  %v191_v29 = vrot.slane %v81_v14, %v1754_v59  ;;  %v195_v30 = vrot.slane %v81_v14, %v1757_v60  ;;  %v199_v31 = vrot.slane %v81_v14, %v1760_v61 }
  0xa5   :  { %v685_v33 = vcombine.low %v676_v24, %v683_v25  ;;  %v203_v34 = vrot.slane %v81_v14, %v1763_v62  ;;  %v701_v35 = vcombine.low %v175_v22, %v179_v23  ;;  %v702_v36 = vcombine.low %v183_v26, %v187_v27 }
  0xa6   :  { %v1793_v32 = vpop.xlane.xlu1 %92  ;;  %v692_v37 = vrot.slane %v684_v28, %v1766_v1  ;;  %v703_v38 = vcombine.low %v191_v29, %v195_v30  ;;  %v223_v39 = vrot.slane %v84_v0, %v1754_v59  ;;  %v227_v40 = vrot.slane %v84_v0, %v1757_v60 }
  0xa7   :  { %v699_v41 = vrot.slane %v685_v33, %v1766_v1  ;;  %v704_v42 = vcombine.low %v199_v31, %v203_v34  ;;  %v711_v43 = vrot.slane %v701_v35, %v1766_v1  ;;  %v718_v44 = vrot.slane %v702_v36, %v1766_v1 }
  0xa8   :  { %v725_v45 = vrot.slane %v703_v38, %v1766_v1  ;;  %v231_v46 = vrot.slane %v84_v0, %v1760_v61  ;;  %v235_v47 = vrot.slane %v84_v0, %v1763_v62  ;;  %v750_v48 = vcombine.low %v207_v12, %v211_v13  ;;  %v90_v13 = vpop.xlane.xlu0 %89 }
  0xa9   :  { %v700_v49 = vcombine.low %v692_v37, %v699_v41  ;;  %v732_v51 = vrot.slane %v704_v42, %v1766_v1  ;;  %v733_v52 = vcombine.low %v711_v43, %v718_v44  ;;  %v751_v54 = vcombine.low %v215_v18, %v219_v19 }
  0xaa   :  { %v752_v63 = vcombine.low %v223_v39, %v227_v40  ;;  %v753_v2 = vcombine.low %v231_v46, %v235_v47  ;;  %v760_v3 = vrot.slane %v750_v48, %v1766_v1  ;;  %v239_v4 = vrot.slane %v1778_v15, %v1742_v55  ;;  %v1809_v5 = vpop.xlane.xlu1 %98 }
  0xab   :  { %1437 = vperm.xlu0 %1643, %v700_v49   ;;  %v734_v6 = vcombine.low %v725_v45, %v732_v51  ;;  %v741_v7 = vrot.slane %v733_v52, %v1766_v1  ;;  %v767_v0 = vrot.slane %v751_v54, %v1766_v1  ;;  %v243_v8 = vrot.slane %v1778_v15, %v1745_v56 }
  0xac   :  { %v774_v9 = vrot.slane %v752_v63, %v1766_v1  ;;  %v781_v10 = vrot.slane %v753_v2, %v1766_v1  ;;  %v247_v11 = vrot.slane %v1778_v15, %v1748_v57  ;;  %v251_v12 = vrot.slane %v1778_v15, %v1751_v58 }
  0xad   :  { %v748_v14 = vrot.slane %v734_v6, %v1766_v1  ;;  %v782_v16 = vcombine.low %v760_v3, %v767_v0  ;;  %v255_v17 = vrot.slane %v1778_v15, %v1754_v59  ;;  %v259_v18 = vrot.slane %v1778_v15, %v1757_v60 }
  0xae   :  { %v783_v19 = vcombine.low %v774_v9, %v781_v10  ;;  %v263_v20 = vrot.slane %v1778_v15, %v1760_v61  ;;  %v267_v21 = vrot.slane %v1778_v15, %v1763_v62  ;;  %v799_v22 = vcombine.low %v239_v4, %v243_v8  ;;  %v105_v31 = vpop.xlane.xlu1 %104 }
  0xaf   :  { %v749_v23 = vcombine.low %v741_v7, %v748_v14  ;;  %v790_v24 = vrot.slane %v782_v16, %v1766_v1  ;;  %v800_v25 = vcombine.low %v247_v11, %v251_v12  ;;  %v801_v26 = vcombine.low %v255_v17, %v259_v18 }
  0xb0   :  { %v797_v27 = vrot.slane %v783_v19, %v1766_v1  ;;  %v802_v28 = vcombine.low %v263_v20, %v267_v21  ;;  %v809_v29 = vrot.slane %v799_v22, %v1766_v1  ;;  %v271_v30 = vrot.slane %v90_v13, %v1742_v55 }
  0xb1   :  { %1440 = vperm.xlu1 %1644, %v749_v23   ;;  %v816_v33 = vrot.slane %v800_v25, %v1766_v1  ;;  %v823_v34 = vrot.slane %v801_v26, %v1766_v1  ;;  %v275_v15 = vrot.slane %v90_v13, %v1745_v56  ;;  %v279_v35 = vrot.slane %v90_v13, %v1748_v57 }
  0xb2   :  { %v798_v36 = vcombine.low %v790_v24, %v797_v27  ;;  %v830_v37 = vrot.slane %v802_v28, %v1766_v1  ;;  %v283_v38 = vrot.slane %v90_v13, %v1751_v58  ;;  %v287_v39 = vrot.slane %v90_v13, %v1754_v59  ;;  %v111_v25 = vpop.xlane.xlu1 %110 }
  0xb3   :  { %v831_v40 = vcombine.low %v809_v29, %v816_v33  ;;  %v291_v41 = vrot.slane %v90_v13, %v1757_v60  ;;  %v295_v42 = vrot.slane %v90_v13, %v1760_v61  ;;  %v299_v43 = vrot.slane %v90_v13, %v1763_v62 }
  0xb4   :  { %v832_v44 = vcombine.low %v823_v34, %v830_v37  ;;  %v848_v45 = vcombine.low %v271_v30, %v275_v15  ;;  %v849_v46 = vcombine.low %v279_v35, %v283_v38  ;;  %v431_v47 = vrot.slane %v105_v31, %v1742_v55 }
  0xb5   :  { %1443 = vperm.xlu1 %1644, %v798_v36   ;;  %v839_v48 = vrot.slane %v831_v40, %v1766_v1  ;;  %v850_v49 = vcombine.low %v287_v39, %v291_v41  ;;  %v851_v51 = vcombine.low %v295_v42, %v299_v43  ;;  %v435_v52 = vrot.slane %v105_v31, %v1745_v56 }
  0xb6   :  { %v846_v54 = vrot.slane %v832_v44, %v1766_v1  ;;  %v858_v63 = vrot.slane %v848_v45, %v1766_v1  ;;  %v865_v2 = vrot.slane %v849_v46, %v1766_v1  ;;  %v439_v3 = vrot.slane %v105_v31, %v1748_v57 }
  0xb7   :  { %v872_v4 = vrot.slane %v850_v49, %v1766_v1  ;;  %v879_v6 = vrot.slane %v851_v51, %v1766_v1  ;;  %v443_v7 = vrot.slane %v105_v31, %v1751_v58  ;;  %v447_v0 = vrot.slane %v105_v31, %v1754_v59  ;;  %v96_v49 = vpop.xlane.xlu0 %95 }
  0xb8   :  { %v847_v8 = vcombine.low %v839_v48, %v846_v54  ;;  %v880_v9 = vcombine.low %v858_v63, %v865_v2  ;;  %v451_v10 = vrot.slane %v105_v31, %v1757_v60  ;;  %v455_v11 = vrot.slane %v105_v31, %v1760_v61 }
  0xb9   :  { %v881_v12 = vcombine.low %v872_v4, %v879_v6  ;;  %v459_v13 = vrot.slane %v105_v31, %v1763_v62  ;;  %v1093_v14 = vcombine.low %v431_v47, %v435_v52  ;;  %v1094_v16 = vcombine.low %v439_v3, %v443_v7 }
  0xba   :  { %1446 = vperm.xlu1 %1644, %v847_v8   ;;  %v888_v17 = vrot.slane %v880_v9, %v1766_v1  ;;  %v1095_v18 = vcombine.low %v447_v0, %v451_v10  ;;  %v303_v19 = vrot.slane %v1793_v32, %v1742_v55  ;;  %v307_v20 = vrot.slane %v1793_v32, %v1745_v56 }
  0xbb   :  { %v895_v21 = vrot.slane %v881_v12, %v1766_v1  ;;  %v1096_v22 = vcombine.low %v455_v11, %v459_v13  ;;  %v1103_v23 = vrot.slane %v1093_v14, %v1766_v1  ;;  %v1110_v24 = vrot.slane %v1094_v16, %v1766_v1 }
  0xbc   :  { %v1117_v26 = vrot.slane %v1095_v18, %v1766_v1  ;;  %v311_v27 = vrot.slane %v1793_v32, %v1748_v57  ;;  %v315_v28 = vrot.slane %v1793_v32, %v1751_v58  ;;  %v319_v29 = vrot.slane %v1793_v32, %v1754_v59 }
  0xbd   :  { %v896_v30 = vcombine.low %v888_v17, %v895_v21  ;;  %v1124_v31 = vrot.slane %v1096_v22, %v1766_v1  ;;  %v1125_v33 = vcombine.low %v1103_v23, %v1110_v24  ;;  %v323_v34 = vrot.slane %v1793_v32, %v1757_v60 }
  0xbe   :  { %v327_v15 = vrot.slane %v1793_v32, %v1760_v61  ;;  %v331_v35 = vrot.slane %v1793_v32, %v1763_v62  ;;  %v897_v36 = vcombine.low %v303_v19, %v307_v20  ;;  %v898_v37 = vcombine.low %v311_v27, %v315_v28  ;;  %v117_v19 = vpop.xlane.xlu1 %116 }
  0xbf   :  { %1449 = vperm.xlu1 %1644, %v896_v30   ;;  %v1126_v38 = vcombine.low %v1117_v26, %v1124_v31  ;;  %v1133_v39 = vrot.slane %v1125_v33, %v1766_v1  ;;  %v899_v40 = vcombine.low %v319_v29, %v323_v34  ;;  %v495_v41 = vrot.slane %v111_v25, %v1742_v55 }
  0xc0   :  { %v900_v42 = vcombine.low %v327_v15, %v331_v35  ;;  %v907_v43 = vrot.slane %v897_v36, %v1766_v1  ;;  %v914_v44 = vrot.slane %v898_v37, %v1766_v1  ;;  %v499_v45 = vrot.slane %v111_v25, %v1745_v56 }
  0xc1   :  { %v1140_v46 = vrot.slane %v1126_v38, %v1766_v1  ;;  %v921_v32 = vrot.slane %v899_v40, %v1766_v1  ;;  %v503_v47 = vrot.slane %v111_v25, %v1748_v57  ;;  %v507_v48 = vrot.slane %v111_v25, %v1751_v58 }
  0xc2   :  { %v928_v51 = vrot.slane %v900_v42, %v1766_v1  ;;  %v929_v52 = vcombine.low %v907_v43, %v914_v44  ;;  %v511_v54 = vrot.slane %v111_v25, %v1754_v59  ;;  %v515_v63 = vrot.slane %v111_v25, %v1757_v60 }
  0xc3   :  { %v1141_v2 = vcombine.low %v1133_v39, %v1140_v46  ;;  %v519_v3 = vrot.slane %v111_v25, %v1760_v61  ;;  %v523_v4 = vrot.slane %v111_v25, %v1763_v62  ;;  %v1191_v6 = vcombine.low %v495_v41, %v499_v45 }
  0xc4   :  { %v930_v7 = vcombine.low %v921_v32, %v928_v51  ;;  %v937_v0 = vrot.slane %v929_v52, %v1766_v1  ;;  %v1192_v8 = vcombine.low %v503_v47, %v507_v48  ;;  %v1193_v9 = vcombine.low %v511_v54, %v515_v63 }
  0xc5   :  { %1464 = vperm.xlu0 %1643, %v1141_v2   ;;  %v1194_v10 = vcombine.low %v519_v3, %v523_v4  ;;  %v1201_v11 = vrot.slane %v1191_v6, %v1766_v1  ;;  %v335_v12 = vrot.slane %v96_v49, %v1742_v55  ;;  %v339_v13 = vrot.slane %v96_v49, %v1745_v56 }
  0xc6   :  { %v944_v14 = vrot.slane %v930_v7, %v1766_v1  ;;  %v1208_v16 = vrot.slane %v1192_v8, %v1766_v1  ;;  %v1215_v17 = vrot.slane %v1193_v9, %v1766_v1  ;;  %v343_v18 = vrot.slane %v96_v49, %v1748_v57 }
  0xc7   :  { %v1222_v20 = vrot.slane %v1194_v10, %v1766_v1  ;;  %v347_v21 = vrot.slane %v96_v49, %v1751_v58  ;;  %v351_v22 = vrot.slane %v96_v49, %v1754_v59  ;;  %v355_v23 = vrot.slane %v96_v49, %v1757_v60 }
  0xc8   :  { %v945_v24 = vcombine.low %v937_v0, %v944_v14  ;;  %v1223_v25 = vcombine.low %v1201_v11, %v1208_v16  ;;  %v359_v26 = vrot.slane %v96_v49, %v1760_v61  ;;  %v363_v27 = vrot.slane %v96_v49, %v1763_v62  ;;  %v123_v0 = vpop.xlane.xlu1 %122 }
  0xc9   :  { %v1224_v28 = vcombine.low %v1215_v17, %v1222_v20  ;;  %v946_v29 = vcombine.low %v335_v12, %v339_v13  ;;  %v947_v30 = vcombine.low %v343_v18, %v347_v21  ;;  %v948_v31 = vcombine.low %v351_v22, %v355_v23  ;;  %v102_v21 = vpop.xlane.xlu0 %101 }
  0xca   :  { %1452 = vperm.xlu1 %1644, %v945_v24   ;;  %v1231_v33 = vrot.slane %v1223_v25, %v1766_v1  ;;  %v949_v34 = vcombine.low %v359_v26, %v363_v27  ;;  %v559_v15 = vrot.slane %v117_v19, %v1742_v55  ;;  %v563_v35 = vrot.slane %v117_v19, %v1745_v56 }
  0xcb   :  { %v1238_v36 = vrot.slane %v1224_v28, %v1766_v1  ;;  %v956_v37 = vrot.slane %v946_v29, %v1766_v1  ;;  %v963_v38 = vrot.slane %v947_v30, %v1766_v1  ;;  %v970_v39 = vrot.slane %v948_v31, %v1766_v1 }
  0xcc   :  { %v977_v40 = vrot.slane %v949_v34, %v1766_v1  ;;  %v567_v41 = vrot.slane %v117_v19, %v1748_v57  ;;  %v571_v42 = vrot.slane %v117_v19, %v1751_v58  ;;  %v575_v43 = vrot.slane %v117_v19, %v1754_v59 }
  0xcd   :  { %v1239_v44 = vcombine.low %v1231_v33, %v1238_v36  ;;  %v978_v45 = vcombine.low %v956_v37, %v963_v38  ;;  %v579_v46 = vrot.slane %v117_v19, %v1757_v60  ;;  %v583_v32 = vrot.slane %v117_v19, %v1760_v61 }
  0xce   :  { %v979_v47 = vcombine.low %v970_v39, %v977_v40  ;;  %v587_v48 = vrot.slane %v117_v19, %v1763_v62  ;;  %v1289_v49 = vcombine.low %v559_v15, %v563_v35  ;;  %v1290_v51 = vcombine.low %v567_v41, %v571_v42 }
  0xcf   :  { %1470 = vperm.xlu0 %1643, %v1239_v44   ;;  %v986_v52 = vrot.slane %v978_v45, %v1766_v1  ;;  %v1291_v54 = vcombine.low %v575_v43, %v579_v46  ;;  %v367_v63 = vrot.slane %v1809_v5, %v1742_v55  ;;  %v371_v2 = vrot.slane %v1809_v5, %v1745_v56  ;;  %v108_v45 = vpop.xlane.xlu0 %107 }
  0xd0   :  { %v993_v3 = vrot.slane %v979_v47, %v1766_v1  ;;  %v1292_v4 = vcombine.low %v583_v32, %v587_v48  ;;  %v1299_v6 = vrot.slane %v1289_v49, %v1766_v1  ;;  %v1306_v7 = vrot.slane %v1290_v51, %v1766_v1 }
  0xd1   :  { %v1313_v8 = vrot.slane %v1291_v54, %v1766_v1  ;;  %v375_v9 = vrot.slane %v1809_v5, %v1748_v57  ;;  %v379_v10 = vrot.slane %v1809_v5, %v1751_v58  ;;  %v383_v11 = vrot.slane %v1809_v5, %v1754_v59 }
  0xd2   :  { %v994_v12 = vcombine.low %v986_v52, %v993_v3  ;;  %v1320_v13 = vrot.slane %v1292_v4, %v1766_v1  ;;  %v1321_v14 = vcombine.low %v1299_v6, %v1306_v7  ;;  %v387_v16 = vrot.slane %v1809_v5, %v1757_v60 }
  0xd3   :  { %v391_v17 = vrot.slane %v1809_v5, %v1760_v61  ;;  %v395_v18 = vrot.slane %v1809_v5, %v1763_v62  ;;  %v995_v19 = vcombine.low %v367_v63, %v371_v2  ;;  %v996_v20 = vcombine.low %v375_v9, %v379_v10 }
  0xd4   :  { %1455 = vperm.xlu1 %1644, %v994_v12   ;;  %v1322_v22 = vcombine.low %v1313_v8, %v1320_v13  ;;  %v1329_v23 = vrot.slane %v1321_v14, %v1766_v1  ;;  %v997_v24 = vcombine.low %v383_v11, %v387_v16  ;;  %v623_v25 = vrot.slane %v123_v0, %v1742_v55 }
  0xd5   :  { %v998_v26 = vcombine.low %v391_v17, %v395_v18  ;;  %v1005_v27 = vrot.slane %v995_v19, %v1766_v1  ;;  %v1012_v28 = vrot.slane %v996_v20, %v1766_v1  ;;  %v627_v29 = vrot.slane %v123_v0, %v1745_v56  ;;  %v114_v18 = vpop.xlane.xlu0 %113 }
  0xd6   :  { %v1336_v30 = vrot.slane %v1322_v22, %v1766_v1  ;;  %v1019_v5 = vrot.slane %v997_v24, %v1766_v1  ;;  %v631_v31 = vrot.slane %v123_v0, %v1748_v57  ;;  %v635_v33 = vrot.slane %v123_v0, %v1751_v58 }
  0xd7   :  { %v1026_v34 = vrot.slane %v998_v26, %v1766_v1  ;;  %v1027_v15 = vcombine.low %v1005_v27, %v1012_v28  ;;  %v639_v35 = vrot.slane %v123_v0, %v1754_v59  ;;  %v643_v36 = vrot.slane %v123_v0, %v1757_v60 }
  0xd8   :  { %v1337_v37 = vcombine.low %v1329_v23, %v1336_v30  ;;  %v647_v38 = vrot.slane %v123_v0, %v1760_v61  ;;  %v651_v39 = vrot.slane %v123_v0, %v1763_v62  ;;  %v1387_v40 = vcombine.low %v623_v25, %v627_v29 }
  0xd9   :  { %v1028_v41 = vcombine.low %v1019_v5, %v1026_v34  ;;  %v1035_v42 = vrot.slane %v1027_v15, %v1766_v1  ;;  %v1388_v43 = vcombine.low %v631_v31, %v635_v33  ;;  %v1389_v44 = vcombine.low %v639_v35, %v643_v36 }
  0xda   :  { %1476 = vperm.xlu0 %1643, %v1337_v37   ;;  %v1390_v46 = vcombine.low %v647_v38, %v651_v39  ;;  %v1397_v32 = vrot.slane %v1387_v40, %v1766_v1  ;;  %v399_v47 = vrot.slane %v102_v21, %v1742_v55  ;;  %v403_v48 = vrot.slane %v102_v21, %v1745_v56 }
  0xdb   :  { %v1042_v49 = vrot.slane %v1028_v41, %v1766_v1  ;;  %v1404_v51 = vrot.slane %v1388_v43, %v1766_v1  ;;  %v1411_v52 = vrot.slane %v1389_v44, %v1766_v1  ;;  %v407_v54 = vrot.slane %v102_v21, %v1748_v57 }
  0xdc   :  { %v1418_v63 = vrot.slane %v1390_v46, %v1766_v1  ;;  %v411_v2 = vrot.slane %v102_v21, %v1751_v58  ;;  %v415_v3 = vrot.slane %v102_v21, %v1754_v59  ;;  %v419_v4 = vrot.slane %v102_v21, %v1757_v60 }
  0xdd   :  { %v1043_v6 = vcombine.low %v1035_v42, %v1042_v49  ;;  %v1419_v7 = vcombine.low %v1397_v32, %v1404_v51  ;;  %v423_v0 = vrot.slane %v102_v21, %v1760_v61  ;;  %v427_v8 = vrot.slane %v102_v21, %v1763_v62  ;;  %v120_v42 = vpop.xlane.xlu0 %119 }
  0xde   :  { %v1420_v9 = vcombine.low %v1411_v52, %v1418_v63  ;;  %v1044_v10 = vcombine.low %v399_v47, %v403_v48  ;;  %v1045_v11 = vcombine.low %v407_v54, %v411_v2  ;;  %v1046_v12 = vcombine.low %v415_v3, %v419_v4 }
  0xdf   :  { %1458 = vperm.xlu1 %1644, %v1043_v6   ;;  %v1427_v13 = vrot.slane %v1419_v7, %v1766_v1  ;;  %v1047_v14 = vcombine.low %v423_v0, %v427_v8  ;;  %v463_v16 = vrot.slane %v108_v45, %v1742_v55  ;;  %v467_v17 = vrot.slane %v108_v45, %v1745_v56 }
  0xe0   :  { %v1434_v19 = vrot.slane %v1420_v9, %v1766_v1  ;;  %v1054_v20 = vrot.slane %v1044_v10, %v1766_v1  ;;  %v1061_v22 = vrot.slane %v1045_v11, %v1766_v1  ;;  %v1068_v21 = vrot.slane %v1046_v12, %v1766_v1 }
  0xe1   :  { %v1075_v23 = vrot.slane %v1047_v14, %v1766_v1  ;;  %v471_v24 = vrot.slane %v108_v45, %v1748_v57  ;;  %v475_v25 = vrot.slane %v108_v45, %v1751_v58  ;;  %v479_v26 = vrot.slane %v108_v45, %v1754_v59 }
  0xe2   :  { %v1435_v27 = vcombine.low %v1427_v13, %v1434_v19  ;;  %v1076_v28 = vcombine.low %v1054_v20, %v1061_v22  ;;  %v483_v29 = vrot.slane %v108_v45, %v1757_v60  ;;  %v487_v30 = vrot.slane %v108_v45, %v1760_v61 }
  0xe3   :  { %v1077_v5 = vcombine.low %v1068_v21, %v1075_v23  ;;  %v491_v31 = vrot.slane %v108_v45, %v1763_v62  ;;  %v1142_v33 = vcombine.low %v463_v16, %v467_v17  ;;  %v1143_v34 = vcombine.low %v471_v24, %v475_v25 }
  0xe4   :  { %1482 = vperm.xlu0 %1643, %v1435_v27   ;;  %v1084_v15 = vrot.slane %v1076_v28, %v1766_v1  ;;  %v1144_v35 = vcombine.low %v479_v26, %v483_v29  ;;  %v527_v36 = vrot.slane %v114_v18, %v1742_v55  ;;  %v531_v37 = vrot.slane %v114_v18, %v1745_v56 }
  0xe5   :  { %v1091_v38 = vrot.slane %v1077_v5, %v1766_v1  ;;  %v1145_v39 = vcombine.low %v487_v30, %v491_v31  ;;  %v1152_v40 = vrot.slane %v1142_v33, %v1766_v1  ;;  %v1159_v41 = vrot.slane %v1143_v34, %v1766_v1 }
  0xe6   :  { %v1166_v43 = vrot.slane %v1144_v35, %v1766_v1  ;;  %v535_v44 = vrot.slane %v114_v18, %v1748_v57  ;;  %v539_v45 = vrot.slane %v114_v18, %v1751_v58  ;;  %v543_v46 = vrot.slane %v114_v18, %v1754_v59 }
  0xe7   :  { %v1092_v32 = vcombine.low %v1084_v15, %v1091_v38  ;;  %v1173_v47 = vrot.slane %v1145_v39, %v1766_v1  ;;  %v1174_v48 = vcombine.low %v1152_v40, %v1159_v41  ;;  %v547_v49 = vrot.slane %v114_v18, %v1757_v60 }
  0xe8   :  { %v551_v51 = vrot.slane %v114_v18, %v1760_v61  ;;  %v555_v52 = vrot.slane %v114_v18, %v1763_v62  ;;  %v1240_v54 = vcombine.low %v527_v36, %v531_v37  ;;  %v1241_v63 = vcombine.low %v535_v44, %v539_v45 }
  0xe9   :  { %1461 = vperm.xlu1 %1644, %v1092_v32   ;;  %v1175_v2 = vcombine.low %v1166_v43, %v1173_v47  ;;  %v1182_v3 = vrot.slane %v1174_v48, %v1766_v1  ;;  %v1242_v4 = vcombine.low %v543_v46, %v547_v49  ;;  %v591_v6 = vrot.slane %v120_v42, %v1742_v55 }
  0xea   :  { %v1243_v7 = vcombine.low %v551_v51, %v555_v52  ;;  %v1250_v0 = vrot.slane %v1240_v54, %v1766_v1  ;;  %v1257_v8 = vrot.slane %v1241_v63, %v1766_v1  ;;  %v595_v9 = vrot.slane %v120_v42, %v1745_v56 }
  0xeb   :  { %v1189_v10 = vrot.slane %v1175_v2, %v1766_v1  ;;  %v1264_v11 = vrot.slane %v1242_v4, %v1766_v1  ;;  %v599_v12 = vrot.slane %v120_v42, %v1748_v57  ;;  %v603_v13 = vrot.slane %v120_v42, %v1751_v58 }
  0xec   :  { %v1271_v14 = vrot.slane %v1243_v7, %v1766_v1  ;;  %v1272_v16 = vcombine.low %v1250_v0, %v1257_v8  ;;  %v607_v55 = vrot.slane %v120_v42, %v1754_v59  ;;  %v611_v17 = vrot.slane %v120_v42, %v1757_v60 }
  0xed   :  { %v1190_v18 = vcombine.low %v1182_v3, %v1189_v10  ;;  %v615_v19 = vrot.slane %v120_v42, %v1760_v61  ;;  %v619_v56 = vrot.slane %v120_v42, %v1763_v62  ;;  %v1338_v20 = vcombine.low %v591_v6, %v595_v9 }
  0xee   :  { %v1273_v22 = vcombine.low %v1264_v11, %v1271_v14  ;;  %v1280_v21 = vrot.slane %v1272_v16, %v1766_v1  ;;  %v1339_v23 = vcombine.low %v599_v12, %v603_v13  ;;  %v1340_v57 = vcombine.low %v607_v55, %v611_v17 }
  0xef   :  { %1467 = vperm.xlu1 %1644, %v1190_v18   ;;  %v1341_v58 = vcombine.low %v615_v19, %v619_v56  ;;  %v1348_v24 = vrot.slane %v1338_v20, %v1766_v1  ;;  %v1694_v5 = vmov 0.0   ;;  %v2023_v36 = vand.u32 127, %v140_v50 }
  0xf0   :  { %v1287_v25 = vrot.slane %v1273_v22, %v1766_v1  ;;  %v1355_v59 = vrot.slane %v1339_v23, %v1766_v1  ;;  %v1362_v60 = vrot.slane %v1340_v57, %v1766_v1  ;;  %34 = vst [vmem:[#allocation2] sm:$0x1] %v1694_v5 }
  0xf1   :  { %v1369_v61 = vrot.slane %v1341_v58, %v1766_v1  ;;  %v1490_v37 = vadd.s32 4294967288, %v2023_v36  ;;  %v1497_v39 = vadd.s32 4294967280, %v2023_v36  ;;  %v1504_v40 = vadd.s32 4294967272, %v2023_v36 }
  0xf2   :  { %v1288_v26 = vcombine.low %v1280_v21, %v1287_v25  ;;  %v1370_v62 = vcombine.low %v1348_v24, %v1355_v59  ;;  %v1511_v41 = vadd.s32 4294967264, %v2023_v36  ;;  %v1518_v43 = vadd.s32 4294967256, %v2023_v36 }
  0xf3   :  { %v1371_v27 = vcombine.low %v1362_v60, %v1369_v61  ;;  %v1493_v42 = vsub.s32 %v1490_v37, %v1739_v53  ;;  %v1500_v45 = vsub.s32 %v1497_v39, %v1739_v53  ;;  %v1525_v46 = vadd.s32 4294967248, %v2023_v36 }
  0xf4   :  { %1473 = vperm.xlu1 %1644, %v1288_v26   ;;  %v1378_v28 = vrot.slane %v1370_v62, %v1766_v1  ;;  %v1488_v50 = vsub.s32 %v2023_v36, %v1739_v53  ;;  %v1507_v32 = vsub.s32 %v1504_v40, %v1739_v53  ;;  %v1532_v47 = vadd.s32 4294967240, %v2023_v36 }
  0xf5   :  { %v1385_v29 = vrot.slane %v1371_v27, %v1766_v1  ;;  %v1514_v49 = vsub.s32 %v1511_v41, %v1739_v53  ;;  %v1539_v51 = vadd.s32 4294967232, %v2023_v36  ;;  %v1521_v54 = vsub.s32 %v1518_v43, %v1739_v53 }
  0xf6   :  { %v1528_v3 = vsub.s32 %v1525_v46, %v1739_v53  ;;  %v1535_v7 = vsub.s32 %v1532_v47, %v1739_v53  ;;  %v1553_v9 = vadd.s32 4294967216, %v2023_v36  ;;  %v1546_v11 = vadd.s32 4294967224, %v2023_v36 }
  0xf7   :  { %v1386_v30 = vcombine.low %v1378_v28, %v1385_v29  ;;  %v1542_v8 = vsub.s32 %v1539_v51, %v1739_v53  ;;  %v1560_v17 = vadd.s32 4294967208, %v2023_v36  ;;  %v1567_v57 = vadd.s32 4294967200, %v2023_v36  ;;  %v74_v47 = vld [vmem:[#allocation2] sm:$0x1] }
  0xf8   :  { %v1556_v22 = vsub.s32 %v1553_v9, %v1739_v53  ;;  %v1549_v21 = vsub.s32 %v1546_v11, %v1739_v53  ;;  %v1574_v59 = vadd.s32 4294967192, %v2023_v36  ;;  %v1581_v29 = vadd.s32 4294967184, %v2023_v36 }
  0xf9   :  { %1479 = vperm.xlu1 %1644, %v1386_v30   ;;  %v1563_v62 = vsub.s32 %v1560_v17, %v1739_v53  ;;  %v1570_v27 = vsub.s32 %v1567_v57, %v1739_v53  ;;  %v1588_v30 = vadd.s32 4294967176, %v2023_v36 }
  0xfa   :  { %v1584_v37 = vsub.s32 %v1581_v29, %v1739_v53 }
 0x126   :  { %v1438_v44 = vpop.permute.xlu0 %1437 }
 0x127   :  { %v1489_v4 = vrot.slane %v1438_v44, %v1488_v50 }
 0x12c   :  { %v1441_v31 = vpop.permute.xlu1 %1440 }
 0x12d   :  { %v1494_v52 = vrot.slane %v1441_v31, %v1493_v42 }
 0x12f   :  { %v1496_v10 = vsel %vm1495_vm1, %v1494_v52, %v1489_v4 }
 0x130   :  { %v1444_v33 = vpop.permute.xlu1 %1443 }
 0x131   :  { %v1501_v63 = vrot.slane %v1444_v33, %v1500_v45 }
 0x133   :  { %v1503_v14 = vsel %vm1502_vm2, %v1501_v63, %v1496_v10 }
 0x135   :  { %v1447_v34 = vpop.permute.xlu1 %1446 }
 0x136   :  { %v1508_v6 = vrot.slane %v1447_v34, %v1507_v32 }
 0x138   :  { %v1510_v55 = vsel %vm1509_vm3, %v1508_v6, %v1503_v14 }
 0x13a   :  { %v1450_v15 = vpop.permute.xlu1 %1449 }
 0x13b   :  { %v1515_v0 = vrot.slane %v1450_v15, %v1514_v49  ;;  %v1577_v15 = vsub.s32 %v1574_v59, %v1739_v53 }
 0x13d   :  { %v1517_v19 = vsel %vm1516_vm4, %v1515_v0, %v1510_v55 }
 0x140   :  { %v1465_v2 = vpop.permute.xlu0 %1464 }
 0x141   :  { %v1550_v26 = vrot.slane %v1465_v2, %v1549_v21 }
 0x145   :  { %v1453_v35 = vpop.permute.xlu1 %1452 }
 0x146   :  { %v1522_v12 = vrot.slane %v1453_v35, %v1521_v54 }
 0x148   :  { %v1524_v23 = vsel %vm1523_vm5, %v1522_v12, %v1517_v19 }
 0x14a   :  { %v1471_v56 = vpop.permute.xlu0 %1470 }
 0x14b   :  { %v1564_v34 = vrot.slane %v1471_v56, %v1563_v62 }
 0x14f   :  { %v1456_v38 = vpop.permute.xlu1 %1455 }
 0x150   :  { %v1529_v16 = vrot.slane %v1456_v38, %v1528_v3  ;;  %v1591_v38 = vsub.s32 %v1588_v30, %v1739_v53  ;;  %v1617_v53 = vstv %s2067_s2 }
 0x152   :  { %v1531_v58 = vsel %vm1530_vm6, %v1529_v16, %v1524_v23 }
 0x155   :  { %v1477_v28 = vpop.permute.xlu0 %1476 }
 0x156   :  { %v1578_v42 = vrot.slane %v1477_v28, %v1577_v15 }
 0x15a   :  { %v1459_v48 = vpop.permute.xlu1 %1458 }
 0x15b   :  { %v1536_v18 = vrot.slane %v1459_v48, %v1535_v7 }
 0x15d   :  { %v1538_v24 = vsel %vm1537_vm7, %v1536_v18, %v1531_v58 }
 0x15f   :  { %v1483_v40 = vpop.permute.xlu0 %1482 }
 0x160   :  { %v1592_v44 = vrot.slane %v1483_v40, %v1591_v38 }
 0x164   :  { %v1462_v13 = vpop.permute.xlu1 %1461 }
 0x165   :  { %v1543_v20 = vrot.slane %v1462_v13, %v1542_v8 }
 0x167   :  { %v1545_v60 = vsel %vm1544_vm8, %v1543_v20, %v1538_v24 }
 0x168   :  { %v1552_v5 = vsel %vm1551_vm9, %v1550_v26, %v1545_v60 }
 0x16a   :  { %v1468_v25 = vpop.permute.xlu1 %1467 }
 0x16b   :  { %v1557_v61 = vrot.slane %v1468_v25, %v1556_v22 }
 0x16d   :  { %v1559_v31 = vsel %vm1558_vm10, %v1557_v61, %v1552_v5 }
 0x16e   :  { %v1566_v39 = vsel %vm1565_vm11, %v1564_v34, %v1559_v31 }
 0x16f   :  { %v1474_v33 = vpop.permute.xlu1 %1473 }
 0x170   :  { %v1571_v35 = vrot.slane %v1474_v33, %v1570_v27 }
 0x172   :  { %v1573_v41 = vsel %vm1572_vm12, %v1571_v35, %v1566_v39 }
 0x173   :  { %v1580_v45 = vsel %vm1579_vm13, %v1578_v42, %v1573_v41 }
 0x174   :  { %v1480_v36 = vpop.permute.xlu1 %1479 }
 0x175   :  { %v1585_v43 = vrot.slane %v1480_v36, %v1584_v37 }
 0x177   :  { %v1587_v46 = vsel %vm1586_vm14, %v1585_v43, %v1580_v45 }
 0x178   :  { %v1594_v50 = vsel %vm1593_vm15, %v1592_v44, %v1587_v46 }
 0x179   :  { %v1601_v32 = vrot.slane %v1594_v50, %v1766_v1 }
 0x17b   :  { %v1608_v48 = vrot.slane %v1601_v32, %v1766_v1 }
 0x17d   :  { %v1610_v49 = vadd.f32 %v1608_v48, %v74_v47 }
 0x17f   :  { %1611 = vst [vmem:[#allocation2] sm:$0x1] %v1610_v49 }
 0x186   :  { %v1615_v51 = vld [vmem:[#allocation2] sm:$0x1] }
 0x187   :  { %v1618_v52 = vadd.f32 %v1617_v53, %v1615_v51 }
 0x189   :  { %1619 = vst [vmem:[#allocation7] sm:$0x1] %v1618_v52 }
 0x18a   :  { %1676 = shalt.err (!%p1673_p9)
}
 0x18b   :  { %1629 = dma.vmem_to_hbm [thread:$0]  %s1627_s23, 16, %s2068_s3, [#allocation6]  }
 0x18c   :  { %1687 = dma.done.wait [#allocation6], 16  }
 0x18d   :  { %1688 = vsyncadd [#allocation6], 4294967280 }
 0x18e   :  { %1633 = vsyncpa [#allocation5], 1 }
 0x18f   :  { %1634 = vsyncpa [#allocation6], 1 }

</bundles_post_ra>
